<compile_context>
chip_gen: v7x
topology: tpu7x:2x2x1
jax: 0.10.0
libtpu: 0.0.40
codegen_flags: <defaults>
</compile_context>

<pallas_src>
import functools

import jax
import jax.numpy as jnp
from jax import lax
from jax.experimental import pallas as pl
from jax.experimental.pallas import tpu as pltpu


DIM = 2        # flow dimension (PyTorch default dim=2)
H = 64         # hidden width  (PyTorch default h=64)
HP = 128       # lane-padded hidden / output width (multiple of 128)
B = 8          # small example batch size (multiple of 8)
ROW_TILE = 128 # row tile for the batch grid (MXU height on v5e)

_HIGHEST = jax.lax.Precision.HIGHEST

# --- packed parameter slab layout (f32, [SLAB_ROWS, HP]) -------------------
ROW_W1T = 0                      # W1 row for the `t` input
ROW_B1, ROW_B2, ROW_B3, ROW_B4 = 1, 2, 3, 4
OFF_W1X = 8                      # W1 rows for x_t (DIM rows)
OFF_W2 = OFF_W1X + HP            # 136
OFF_W3 = OFF_W2 + HP             # 264
OFF_W4 = OFF_W3 + HP             # 392
SLAB_ROWS = OFF_W4 + HP          # 520 (multiple of 8)


def _elu(x):
    # ELU with alpha=1.0 (PyTorch nn.ELU default): x if x>0 else exp(x)-1.
    # TODO(synk): PyTorch uses expm1; exp(x)-1 differs by ~1e-7 abs near 0 but
    # is kept for guaranteed Mosaic lowering of the transcendental.
    return jnp.where(x > 0.0, x, jnp.exp(x) - 1.0)


def _read_small_rows(slab_ref):
    """Load the loop-invariant [1, HP] parameter rows once."""
    w1t = slab_ref[ROW_W1T:ROW_W1T + 1, :]
    w1x = [slab_ref[OFF_W1X + d:OFF_W1X + d + 1, :] for d in range(DIM)]
    b1 = slab_ref[ROW_B1:ROW_B1 + 1, :]
    b2 = slab_ref[ROW_B2:ROW_B2 + 1, :]
    b3 = slab_ref[ROW_B3:ROW_B3 + 1, :]
    b4 = slab_ref[ROW_B4:ROW_B4 + 1, :]
    return w1t, w1x, b1, b2, b3, b4


def _mlp(slab_ref, consts, t_term, x_cols):
    """One Flow MLP evaluation with every operand resident in VMEM.

    slab_ref : [SLAB_ROWS, HP] packed parameters (for the 3 big weights)
    consts   : hoisted small rows (w1t, w1x[DIM], b1..b4), each [1, HP]
    t_term   : scalar or [rows, 1] -- the `t` input
    x_cols   : list of DIM [rows, 1] columns of x_t
    returns  : [rows, HP] f32 velocity; columns >= DIM are exactly zero.
    """
    w1t, w1x, b1, b2, b3, b4 = consts
    # Layer 1: K = DIM+1 contraction as VPU broadcast-FMAs (no MXU pass).
    pre = t_term * w1t + b1
    for d in range(DIM):
        pre = pre + x_cols[d] * w1x[d]
    h = _elu(pre)
    h = _elu(jnp.dot(h, slab_ref[OFF_W2:OFF_W2 + HP, :],
                     precision=_HIGHEST,
                     preferred_element_type=jnp.float32) + b2)
    h = _elu(jnp.dot(h, slab_ref[OFF_W3:OFF_W3 + HP, :],
                     precision=_HIGHEST,
                     preferred_element_type=jnp.float32) + b3)
    return (jnp.dot(h, slab_ref[OFF_W4:OFF_W4 + HP, :],
                    precision=_HIGHEST,
                    preferred_element_type=jnp.float32) + b4)


def flow_fwd_kernel(t_ref, x_ref, slab_ref, out_ref):
    """Flow.forward for one row tile: concat fused in, lane-dense output."""
    consts = _read_small_rows(slab_ref)
    x_cols = [x_ref[:, d:d + 1] for d in range(DIM)]
    out_ref[...] = _mlp(slab_ref, consts, t_ref[...], x_cols)


def flow_sample_kernel(x0_ref, slab_ref, out_ref, *, n_steps):
    """Full midpoint-Euler integration of Flow.step over t in [0, 1], fused
    into one kernel invocation per row tile: x carried as a lane-dense
    [rows, HP] value (tail lanes stay exactly 0), weights read from the
    resident VMEM slab, invariant rows hoisted, loop fully unrolled."""
    dt = 1.0 / n_steps
    consts = _read_small_rows(slab_ref)

    def velocity(t_scalar, x):
        x_cols = [x[:, d:d + 1] for d in range(DIM)]
        return _mlp(slab_ref, consts, t_scalar, x_cols)

    def body(i, x):
        t0 = i.astype(jnp.float32) * dt
        v1 = velocity(t0, x)
        x_mid = x + (0.5 * dt) * v1
        v2 = velocity(t0 + 0.5 * dt, x_mid)
        return x + dt * v2

    out_ref[...] = lax.fori_loop(0, n_steps, body, x0_ref[...], unroll=True)


# --------------------------- host-side wrappers ----------------------------

def init_flow_params(key, dim=DIM, h=H):
    """nn.Linear-style init U(-1/sqrt(fan_in), 1/sqrt(fan_in)).
    Weights stored as [in, out] (transpose of PyTorch's [out, in])."""
    sizes = [(dim + 1, h), (h, h), (h, h), (h, dim)]
    params = []
    for fan_in, fan_out in sizes:
        key, kw, kb = jax.random.split(key, 3)
        bound = 1.0 / jnp.sqrt(jnp.float32(fan_in))
        w = jax.random.uniform(kw, (fan_in, fan_out), jnp.float32, -bound, bound)
        b = jax.random.uniform(kb, (1, fan_out), jnp.float32, -bound, bound)
        params.extend([w, b])
    return tuple(params)


def pack_params(params):
    """Pack all weights/biases into one zero-padded [SLAB_ROWS, HP] f32 slab."""
    w1, b1, w2, b2, w3, b3, w4, b4 = params
    slab = jnp.zeros((SLAB_ROWS, HP), jnp.float32)
    slab = slab.at[ROW_W1T, :H].set(w1[0])
    slab = slab.at[ROW_B1, :H].set(b1[0])
    slab = slab.at[ROW_B2, :H].set(b2[0])
    slab = slab.at[ROW_B3, :H].set(b3[0])
    slab = slab.at[ROW_B4, :DIM].set(b4[0])
    slab = slab.at[OFF_W1X:OFF_W1X + DIM, :H].set(w1[1:])
    slab = slab.at[OFF_W2:OFF_W2 + H, :H].set(w2)
    slab = slab.at[OFF_W3:OFF_W3 + H, :H].set(w3)
    slab = slab.at[OFF_W4:OFF_W4 + H, :DIM].set(w4)
    return slab


def _round_up(n, m):
    return ((n + m - 1) // m) * m


def _rows_and_tile(n):
    rows = _round_up(n, 8)
    if rows > ROW_TILE:
        rows = _round_up(n, ROW_TILE)
        return rows, ROW_TILE
    return rows, rows


def _pad_rows_to(a, rows):
    pad = rows - a.shape[0]
    if pad:
        a = jnp.pad(a, ((0, pad),) + ((0, 0),) * (a.ndim - 1))
    return a


def flow_forward(t, x_t, slab):
    """Equivalent of Flow.forward(t, x_t). Row-tiled ("parallel") grid."""
    n = t.shape[0]
    rows, tile = _rows_and_tile(n)
    t_p = _pad_rows_to(t.astype(jnp.float32), rows)
    x_p = _pad_rows_to(x_t.astype(jnp.float32), rows)
    out = pl.pallas_call(
        flow_fwd_kernel,
        out_shape=jax.ShapeDtypeStruct((rows, HP), jnp.float32),
        grid=(rows // tile,),
        in_specs=[
            pl.BlockSpec((tile, 1), lambda i: (i, 0)),
            pl.BlockSpec((tile, DIM), lambda i: (i, 0)),
            pl.BlockSpec((SLAB_ROWS, HP), lambda i: (0, 0)),  # resident slab
        ],
        out_specs=pl.BlockSpec((tile, HP), lambda i: (i, 0)),
        compiler_params=pltpu.CompilerParams(dimension_semantics=("parallel",)),
    )(t_p, x_p, slab)
    return out[:n, :DIM]


def flow_sample(x0, slab, n_steps=8):
    """Iterate Flow.step (midpoint rule) from t=0 to t=1 in n_steps equal
    steps, with the entire loop inside a single pallas_call (per row tile)."""
    n = x0.shape[0]
    rows, tile = _rows_and_tile(n)
    x_p = _pad_rows_to(x0.astype(jnp.float32), rows)
    x_p = jnp.pad(x_p, ((0, 0), (0, HP - DIM)))          # lane-dense carry
    out = pl.pallas_call(
        functools.partial(flow_sample_kernel, n_steps=n_steps),
        out_shape=jax.ShapeDtypeStruct((rows, HP), jnp.float32),
        grid=(rows // tile,),
        in_specs=[
            pl.BlockSpec((tile, HP), lambda i: (i, 0)),
            pl.BlockSpec((SLAB_ROWS, HP), lambda i: (0, 0)),  # resident slab
        ],
        out_specs=pl.BlockSpec((tile, HP), lambda i: (i, 0)),
        compiler_params=pltpu.CompilerParams(dimension_semantics=("parallel",)),
    )(x_p, slab)
    return out[:n, :DIM]


# ------------------------------ references ---------------------------------

def _dense_ref(x, w, b):
    return jnp.dot(x, w, precision=_HIGHEST) + b


def flow_forward_ref(t, x_t, params):
    w1, b1, w2, b2, w3, b3, w4, b4 = params
    x = jnp.concatenate([t, x_t], axis=-1)
    h = _elu(_dense_ref(x, w1, b1))
    h = _elu(_dense_ref(h, w2, b2))
    h = _elu(_dense_ref(h, w3, b3))
    return _dense_ref(h, w4, b4)


def flow_sample_ref(x0, params, n_steps=8):
    dt = 1.0 / n_steps
    x = x0
    for i in range(n_steps):
        t0 = jnp.full((x.shape[0], 1), i * dt, jnp.float32)
        tm = jnp.full((x.shape[0], 1), i * dt + 0.5 * dt, jnp.float32)
        v1 = flow_forward_ref(t0, x, params)
        x = x + dt * flow_forward_ref(tm, x + 0.5 * dt * v1, params)
    return x


if __name__ == "__main__":
    key = jax.random.PRNGKey(0)
    kp, kt, kx = jax.random.split(key, 3)

    params = init_flow_params(kp)
    slab = pack_params(params)

    # Flow.forward inputs: t is [B, 1], x_t is [B, dim].
    t = jax.random.uniform(kt, (B, 1), jnp.float32)
    x_t = jax.random.normal(kx, (B, DIM), jnp.float32)

    out = jax.block_until_ready(flow_forward(t, x_t, slab))
    ref = flow_forward_ref(t, x_t, params)
    assert out.shape == (B, DIM)
    assert jnp.allclose(out, ref, atol=1e-4, rtol=1e-4), "forward mismatch vs reference"

    # Fused ODE sampling (iterated Flow.step), whole loop inside one kernel.
    n_steps = 8
    xs = jax.block_until_ready(flow_sample(x_t, slab, n_steps))
    xs_ref = flow_sample_ref(x_t, params, n_steps)
    assert xs.shape == (B, DIM)
    assert jnp.allclose(xs, xs_ref, atol=1e-3, rtol=1e-3), "sample mismatch vs reference"

    # Exercise the multi-tile row grid (rows > ROW_TILE -> grid=(2,), the
    # "parallel" axis that splits across both TensorCores on v7x).
    NB = 130
    kt2, kx2 = jax.random.split(kx)
    t2 = jax.random.uniform(kt2, (NB, 1), jnp.float32)
    x2 = jax.random.normal(kx2, (NB, DIM), jnp.float32)
    out2 = jax.block_until_ready(flow_forward(t2, x2, slab))
    ref2 = flow_forward_ref(t2, x2, params)
    assert out2.shape == (NB, DIM)
    assert jnp.allclose(out2, ref2, atol=1e-4, rtol=1e-4), "tiled forward mismatch"

    print("KERNEL_OK")
</pallas_src>

<mosaic_0001>
module attributes {stable_mosaic.version = 11 : i64} {
  func.func @flow_fwd_kernel(%arg0: i32, %arg1: memref<8x1xf32, #tpu.memory_space<vmem>>, %arg2: memref<8x2xf32, #tpu.memory_space<vmem>>, %arg3: memref<520x128xf32, #tpu.memory_space<vmem>>, %arg4: memref<8x128xf32, #tpu.memory_space<vmem>>) attributes {dimension_semantics = [#tpu.dimension_semantics<parallel>], iteration_bounds = array<i64: 1>, scalar_prefetch = 0 : i64, scratch_operands = 0 : i64, tpu.core_type = #tpu.core_type<tc>, window_params = [{transform_indices = @transform_0, window_bounds = array<i64: 8, 1>}, {transform_indices = @transform_1, window_bounds = array<i64: 8, 2>}, {pipeline_mode = #tpu.pipeline_mode<synchronous>, transform_indices = @transform_2, window_bounds = array<i64: 520, 128>}, {transform_indices = @transform_3, window_bounds = array<i64: 8, 128>}]} {
    %c0 = arith.constant 0 : index
    %c0_0 = arith.constant 0 : index
    %0 = vector.load %arg3[%c0, %c0_0] : memref<520x128xf32, #tpu.memory_space<vmem>>, vector<1x128xf32>
    %c8 = arith.constant 8 : index
    %c0_1 = arith.constant 0 : index
    %1 = vector.load %arg3[%c8, %c0_1] : memref<520x128xf32, #tpu.memory_space<vmem>>, vector<1x128xf32>
    %c9 = arith.constant 9 : index
    %c0_2 = arith.constant 0 : index
    %2 = vector.load %arg3[%c9, %c0_2] : memref<520x128xf32, #tpu.memory_space<vmem>>, vector<1x128xf32>
    %c1 = arith.constant 1 : index
    %c0_3 = arith.constant 0 : index
    %3 = vector.load %arg3[%c1, %c0_3] : memref<520x128xf32, #tpu.memory_space<vmem>>, vector<1x128xf32>
    %c2 = arith.constant 2 : index
    %c0_4 = arith.constant 0 : index
    %4 = vector.load %arg3[%c2, %c0_4] : memref<520x128xf32, #tpu.memory_space<vmem>>, vector<1x128xf32>
    %c3 = arith.constant 3 : index
    %c0_5 = arith.constant 0 : index
    %5 = vector.load %arg3[%c3, %c0_5] : memref<520x128xf32, #tpu.memory_space<vmem>>, vector<1x128xf32>
    %c4 = arith.constant 4 : index
    %c0_6 = arith.constant 0 : index
    %6 = vector.load %arg3[%c4, %c0_6] : memref<520x128xf32, #tpu.memory_space<vmem>>, vector<1x128xf32>
    %c0_7 = arith.constant 0 : index
    %c0_8 = arith.constant 0 : index
    %7 = vector.load %arg2[%c0_7, %c0_8] : memref<8x2xf32, #tpu.memory_space<vmem>>, vector<8x1xf32>
    %c0_9 = arith.constant 0 : index
    %c1_10 = arith.constant 1 : index
    %8 = vector.load %arg2[%c0_9, %c1_10] : memref<8x2xf32, #tpu.memory_space<vmem>>, vector<8x1xf32>
    %c0_11 = arith.constant 0 : index
    %c0_12 = arith.constant 0 : index
    %9 = vector.load %arg1[%c0_11, %c0_12] : memref<8x1xf32, #tpu.memory_space<vmem>>, vector<8x1xf32>
    %10 = vector.broadcast %9 : vector<8x1xf32> to vector<8x128xf32>
    %11 = vector.broadcast %0 : vector<1x128xf32> to vector<8x128xf32>
    %12 = arith.mulf %10, %11 : vector<8x128xf32>
    %13 = vector.broadcast %3 : vector<1x128xf32> to vector<8x128xf32>
    %14 = arith.addf %12, %13 : vector<8x128xf32>
    %15 = vector.broadcast %7 : vector<8x1xf32> to vector<8x128xf32>
    %16 = vector.broadcast %1 : vector<1x128xf32> to vector<8x128xf32>
    %17 = arith.mulf %15, %16 : vector<8x128xf32>
    %18 = arith.addf %14, %17 : vector<8x128xf32>
    %19 = vector.broadcast %8 : vector<8x1xf32> to vector<8x128xf32>
    %20 = vector.broadcast %2 : vector<1x128xf32> to vector<8x128xf32>
    %21 = arith.mulf %19, %20 : vector<8x128xf32>
    %22 = arith.addf %18, %21 : vector<8x128xf32>
    %cst = arith.constant 0.000000e+00 : f32
    %23 = vector.broadcast %cst : f32 to vector<8x128xf32>
    %24 = arith.cmpf ogt, %22, %23 : vector<8x128xf32>
    %25 = math.exp %22 : vector<8x128xf32>
    %cst_13 = arith.constant 1.000000e+00 : f32
    %26 = vector.broadcast %cst_13 : f32 to vector<8x128xf32>
    %27 = arith.subf %25, %26 : vector<8x128xf32>
    %28 = arith.select %24, %22, %27 : vector<8x128xi1>, vector<8x128xf32>
    %c136 = arith.constant 136 : index
    %c0_14 = arith.constant 0 : index
    %29 = vector.load %arg3[%c136, %c0_14] : memref<520x128xf32, #tpu.memory_space<vmem>>, vector<128x128xf32>
    %cst_15 = arith.constant dense<0.000000e+00> : vector<8x128xf32>
    %30 = tpu.matmul %28, %29, %cst_15 {dimension_numbers = #tpu.dot_dimension_numbers<[1], [0], [0], [1], [0, 0, 1, 1], [], []>, precision = #tpu.contract_precision<fp32>} : vector<8x128xf32>, vector<128x128xf32>, vector<8x128xf32> -> vector<8x128xf32>
    %31 = vector.broadcast %4 : vector<1x128xf32> to vector<8x128xf32>
    %32 = arith.addf %30, %31 : vector<8x128xf32>
    %cst_16 = arith.constant 0.000000e+00 : f32
    %33 = vector.broadcast %cst_16 : f32 to vector<8x128xf32>
    %34 = arith.cmpf ogt, %32, %33 : vector<8x128xf32>
    %35 = math.exp %32 : vector<8x128xf32>
    %cst_17 = arith.constant 1.000000e+00 : f32
    %36 = vector.broadcast %cst_17 : f32 to vector<8x128xf32>
    %37 = arith.subf %35, %36 : vector<8x128xf32>
    %38 = arith.select %34, %32, %37 : vector<8x128xi1>, vector<8x128xf32>
    %c264 = arith.constant 264 : index
    %c0_18 = arith.constant 0 : index
    %39 = vector.load %arg3[%c264, %c0_18] : memref<520x128xf32, #tpu.memory_space<vmem>>, vector<128x128xf32>
    %cst_19 = arith.constant dense<0.000000e+00> : vector<8x128xf32>
    %40 = tpu.matmul %38, %39, %cst_19 {dimension_numbers = #tpu.dot_dimension_numbers<[1], [0], [0], [1], [0, 0, 1, 1], [], []>, precision = #tpu.contract_precision<fp32>} : vector<8x128xf32>, vector<128x128xf32>, vector<8x128xf32> -> vector<8x128xf32>
    %41 = vector.broadcast %5 : vector<1x128xf32> to vector<8x128xf32>
    %42 = arith.addf %40, %41 : vector<8x128xf32>
    %cst_20 = arith.constant 0.000000e+00 : f32
    %43 = vector.broadcast %cst_20 : f32 to vector<8x128xf32>
    %44 = arith.cmpf ogt, %42, %43 : vector<8x128xf32>
    %45 = math.exp %42 : vector<8x128xf32>
    %cst_21 = arith.constant 1.000000e+00 : f32
    %46 = vector.broadcast %cst_21 : f32 to vector<8x128xf32>
    %47 = arith.subf %45, %46 : vector<8x128xf32>
    %48 = arith.select %44, %42, %47 : vector<8x128xi1>, vector<8x128xf32>
    %c392 = arith.constant 392 : index
    %c0_22 = arith.constant 0 : index
    %49 = vector.load %arg3[%c392, %c0_22] : memref<520x128xf32, #tpu.memory_space<vmem>>, vector<128x128xf32>
    %cst_23 = arith.constant dense<0.000000e+00> : vector<8x128xf32>
    %50 = tpu.matmul %48, %49, %cst_23 {dimension_numbers = #tpu.dot_dimension_numbers<[1], [0], [0], [1], [0, 0, 1, 1], [], []>, precision = #tpu.contract_precision<fp32>} : vector<8x128xf32>, vector<128x128xf32>, vector<8x128xf32> -> vector<8x128xf32>
    %51 = vector.broadcast %6 : vector<1x128xf32> to vector<8x128xf32>
    %52 = arith.addf %50, %51 : vector<8x128xf32>
    %c0_24 = arith.constant 0 : index
    %c0_25 = arith.constant 0 : index
    %53 = vector.load %arg4[%c0_24, %c0_25] : memref<8x128xf32, #tpu.memory_space<vmem>>, vector<8x128xf32>
    tpu.vector_store %arg4[%c0_24, %c0_25], %52 {strides = array<i32>} : memref<8x128xf32, #tpu.memory_space<vmem>>, vector<8x128xf32>,
    return
  }
  func.func @transform_0(%arg0: i32) -> (i32, i32) {
    %c0_i32 = arith.constant 0 : i32
    %c0_i32_0 = arith.constant 0 : i32
    return %arg0, %c0_i32 : i32, i32
  }
  func.func @transform_1(%arg0: i32) -> (i32, i32) {
    %c0_i32 = arith.constant 0 : i32
    %c0_i32_0 = arith.constant 0 : i32
    return %arg0, %c0_i32 : i32, i32
  }
  func.func @transform_2(%arg0: i32) -> (i32, i32) {
    %c0_i32 = arith.constant 0 : i32
    %c0_i32_0 = arith.constant 0 : i32
    %c0_i32_1 = arith.constant 0 : i32
    return %c0_i32, %c0_i32_0 : i32, i32
  }
  func.func @transform_3(%arg0: i32) -> (i32, i32) {
    %c0_i32 = arith.constant 0 : i32
    %c0_i32_0 = arith.constant 0 : i32
    return %arg0, %c0_i32 : i32, i32
  }
}

</mosaic_0001>

<bundles_post_ra>
// kernel: tpu_custom_call.1
= control target key start
LH: loop header
LB: loop body
LE: loop exit
PB: predicated region body
PF: predicated region fallthrough
CT: control target
= control target key end

     0   :  { %8 = vsyncpa [#allocation3], 0  ;;  %s4410_s0 = inlined_call_operand.vmem [shape: f32[8,1], index: 0, kind: input, shape index: {}]   ;;  %s4411_s1 = inlined_call_operand.vmem [shape: f32[8,2], index: 1, kind: input, shape index: {}]   ;;  %s4412_s2 = inlined_call_operand.hbm [shape: f32[520,128], index: 2, kind: input, shape index: {}]   ;;  %s4413_s3 = inlined_call_operand.hbm [shape: f32[8,128], index: 3, kind: output, shape index: {}]  }
   0x1   :  { %9 = vsyncpa [#allocation4], 0  ;;  %s3564_s12 = smov [#allocation2]   ;;  %s3516_s16 = scalar_lea.hbm %s4412_s2, 8320 }
   0x2   :  { %s19_s13 = sshll.u32 %s3564_s12, 4  ;;  %p3517_p0 = scmp.ne.s32.totalorder %s4412_s2, %s3516_s16  ;;  %s20_s13 = int_to_ptr.vmem [resolvable:$true] %s19_s13 }
   0x3   :  { %p3520_p1 = scmp.lt.u32.totalorder %s3516_s16, %s4412_s2 }
   0x5   :  { %p3522_p2 = pnand %p3520_p1, %p3517_p0 }
   0x7   :  { %3525 = shalt.err (!%p3522_p2)
}
   0x8   :  { %s3526_s21 = scalar_lea.vmem %s20_s13, 8320  ;;  %p3531_p4 = scmp.lt.s32.totalorder %s20_s13, %s20_s13 }
   0x9   :  { %p3527_p3 = scmp.ne.s32.totalorder %s20_s13, %s3526_s21  ;;  %p3532_p5 = scmp.lt.s32.totalorder %s3526_s21, %s3526_s21 }
   0xb   :  { %p3533_p6 = por %p3532_p5, %p3531_p4 }
   0xd   :  { %p3534_p7 = pnand %p3533_p6, %p3527_p3 }
   0xf   :  { %3537 = shalt.err (!%p3534_p7)
}
  0x10   :  { %s3565_s22 = smov 128   ;;  %s3566_s23 = smov 8  }
  0x11   :  { %25 = dma.hbm_to_vmem [thread:$0]  %s4412_s2, 8320, %s20_s13, [#allocation3], %s3565_s22, %s3565_s22, %s3566_s23  }
  0x12   :  { %3560 = dma.done.wait [#allocation3], 8320  }
  0x13   :  { %3561 = vsyncadd [#allocation3], 4294958976  ;;  %v3567_v0 = vmov 0   ;;  %v3568_v1 = vmov 1   ;;  %v3569_v2 = vmov 0.0|0.0   ;;  %v37_v3 = vld [vmem:[%s4410_s0] sm:$0xff] }
  0x14   :  { %3507 = vset.pattern.permute.xlu0 %v3567_v0  ;;  %3508 = vset.pattern.permute.xlu1 %v3568_v1  ;;  %v36_v4 = vld [vmem:[%s4411_s1] sm:$0xff]  ;;  %v79_v5 = vld [vmem:[#allocation2 + $0x88] sm:$0xff]  ;;  %v80_v6 = vld [vmem:[#allocation2 + $0x90] sm:$0xff]  ;;  %vm3570_vm0 = vmmov 0   ;;  %v3571_v63 = vmov 0.0   ;;  %s3572_s0 = smov [#allocation5]  }
  0x15   :  { %3106 = vmatprep.subr.bf16.mxu0 %v3569_v2  ;;  %3034 = vmatprep.subr.bf16.mxu1 %v3569_v2  ;;  %v100_v7 = vand.u32 4294901760, %v79_v5  ;;  %v103_v8 = vand.u32 4294901760, %v80_v6  ;;  %v81_v9 = vld [vmem:[#allocation2 + $0x98] sm:$0xff]  ;;  %v82_v10 = vld [vmem:[#allocation2 + $0xa0] sm:$0xff]  ;;  %v83_v16 = vld [vmem:[#allocation2 + $0xa8] sm:$0xff]  ;;  %s2079_s1 = sshll.u32 %s3572_s0, 4  ;;  %s2080_s1 = int_to_ptr.vmem [resolvable:$true] %s2079_s1 }
  0x16   :  { %40 = vperm.xlu0 %3507, %v37_v3   ;;  %65 = vperm.xlu1 %3508, %v36_v4   ;;  %v106_v11 = vand.u32 4294901760, %v81_v9  ;;  %v109_v12 = vand.u32 4294901760, %v82_v10  ;;  %v84_v17 = vld [vmem:[#allocation2 + $0xb0] sm:$0xff]  ;;  %v112_v19 = vand.u32 4294901760, %v83_v16  ;;  %v85_v23 = vld [vmem:[#allocation2 + $0xb8] sm:$0xff]  ;;  %v86_v24 = vld [vmem:[#allocation2 + $0xc0] sm:$0xff]  ;;  %p3543_p9 = scmp.lt.s32.totalorder %s2080_s1, %s2080_s1 }
  0x17   :  { %v3613_v13 = vpack.c.bf16 %v103_v8, %v100_v7  ;;  %v3615_v14 = vsub.f32 %v79_v5, %v100_v7  ;;  %v3617_v15 = vsub.f32 %v80_v6, %v103_v8  ;;  %v115_v20 = vand.u32 4294901760, %v84_v17  ;;  %v87_v28 = vld [vmem:[#allocation2 + $0xc8] sm:$0xff]  ;;  %v88_v29 = vld [vmem:[#allocation2 + $0xd0] sm:$0xff]  ;;  %v89_v33 = vld [vmem:[#allocation2 + $0xd8] sm:$0xff]  ;;  %2541 = vmatprep.mubr.msk.f32.mxu0 %vm3570_vm0, %v3571_v63  ;;  %2436 = vmatprep.mubr.msk.f32.mxu1 %vm3570_vm0, %v3571_v63  ;;  %s3538_s2 = scalar_lea.vmem %s2080_s1, 128 }
  0x18   :  { %v3621_v18 = vpack.c.bf16 %v109_v12, %v106_v11  ;;  %v3624_v21 = vsub.f32 %v81_v9, %v106_v11  ;;  %v3626_v22 = vsub.f32 %v82_v10, %v109_v12  ;;  %v118_v26 = vand.u32 4294901760, %v85_v23  ;;  %v90_v34 = vld [vmem:[#allocation2 + $0xe0] sm:$0xff]  ;;  %v91_v38 = vld [vmem:[#allocation2 + $0xe8] sm:$0xff]  ;;  %v92_v39 = vld [vmem:[#allocation2 + $0xf0] sm:$0xff]  ;;  %p3539_p8 = scmp.ne.s32.totalorder %s2080_s1, %s3538_s2  ;;  %p3544_p10 = scmp.lt.s32.totalorder %s3538_s2, %s3538_s2 }
  0x19   :  { %3108 = vmatpush3.bf16.msra.mxu0 %v3613_v13  ;;  %3036 = vmatpush3.bf16.msra.mxu1 %v3613_v13  ;;  %v3631_v25 = vpack.c.bf16 %v115_v20, %v112_v19  ;;  %v121_v27 = vand.u32 4294901760, %v86_v24  ;;  %v124_v31 = vand.u32 4294901760, %v87_v28  ;;  %v127_v32 = vand.u32 4294901760, %v88_v29  ;;  %v93_v43 = vld [vmem:[#allocation2 + $0xf8] sm:$0xff]  ;;  %v94_v44 = vld [vmem:[#allocation2 + $0x100] sm:$0xff] }
  0x1a   :  { %55 = vperm.xlu0 %3507, %v36_v4   ;;  %3109 = vmatprep.subr.bf16.mxu0 %v3569_v2  ;;  %v130_v36 = vand.u32 4294901760, %v89_v33  ;;  %v133_v37 = vand.u32 4294901760, %v90_v34  ;;  %v136_v41 = vand.u32 4294901760, %v91_v38  ;;  %v139_v42 = vand.u32 4294901760, %v92_v39  ;;  %p3545_p11 = por %p3544_p10, %p3543_p9 }
  0x1b   :  { %3037 = vmatprep.subr.bf16.mxu1 %v3569_v2  ;;  %v3637_v30 = vpack.c.bf16 %v121_v27, %v118_v26  ;;  %v3643_v35 = vpack.c.bf16 %v127_v32, %v124_v31  ;;  %v142_v45 = vand.u32 4294901760, %v93_v43  ;;  %v145_v46 = vand.u32 4294901760, %v94_v44 }
  0x1c   :  { %v3649_v40 = vpack.c.bf16 %v133_v37, %v130_v36  ;;  %v3655_v47 = vpack.c.bf16 %v139_v42, %v136_v41  ;;  %v3661_v49 = vsub.f32 %v83_v16, %v112_v19  ;;  %v3663_v50 = vsub.f32 %v84_v17, %v115_v20  ;;  %p3546_p12 = pnand %p3545_p11, %p3539_p8 }
  0x1d   :  { %3111 = vmatpush3.bf16.msra.mxu0 %v3621_v18  ;;  %3039 = vmatpush3.bf16.msra.mxu1 %v3621_v18  ;;  %v3659_v48 = vpack.c.bf16 %v145_v46, %v142_v45  ;;  %v3665_v51 = vsub.f32 %v85_v23, %v118_v26  ;;  %v3667_v52 = vsub.f32 %v86_v24, %v121_v27  ;;  %v193_v61 = vand.u32 4294901760, %v3615_v14 }
  0x1e   :  { %3509 = vset.pattern.permute.xlu0 %v3568_v1  ;;  %3112 = vmatprep.subr.bf16.mxu0 %v3569_v2  ;;  %v3669_v53 = vsub.f32 %v87_v28, %v124_v31  ;;  %v3671_v54 = vsub.f32 %v88_v29, %v127_v32  ;;  %v3673_v55 = vsub.f32 %v89_v33, %v130_v36  ;;  %v200_v62 = vand.u32 4294901760, %v3617_v15 }
  0x1f   :  { %3040 = vmatprep.subr.bf16.mxu1 %v3569_v2  ;;  %v3675_v56 = vsub.f32 %v90_v34, %v133_v37  ;;  %v3678_v57 = vsub.f32 %v91_v38, %v136_v41  ;;  %v3680_v58 = vsub.f32 %v92_v39, %v139_v42  ;;  %v3684_v59 = vsub.f32 %v93_v43, %v142_v45 }
  0x20   :  { %v3686_v60 = vsub.f32 %v94_v44, %v145_v46  ;;  %v3696_v0 = vpack.c.bf16 %v200_v62, %v193_v61  ;;  %v194_v1 = vsub.f32 %v3615_v14, %v193_v61  ;;  %v201_v3 = vsub.f32 %v3617_v15, %v200_v62 }
  0x21   :  { %3114 = vmatpush3.bf16.msra.mxu0 %v3631_v25  ;;  %3042 = vmatpush3.bf16.msra.mxu1 %v3631_v25  ;;  %v207_v4 = vand.u32 4294901760, %v3624_v21  ;;  %v214_v5 = vand.u32 4294901760, %v3626_v22  ;;  %v221_v16 = vand.u32 4294901760, %v3661_v49  ;;  %v228_v17 = vand.u32 4294901760, %v3663_v50 }
  0x22   :  { %3115 = vmatprep.subr.bf16.mxu0 %v3569_v2  ;;  %3043 = vmatprep.subr.bf16.mxu1 %v3569_v2  ;;  %v195_v6 = vand.u32 4294901760, %v194_v1  ;;  %v202_v7 = vand.u32 4294901760, %v201_v3  ;;  %v235_v29 = vand.u32 4294901760, %v3665_v51  ;;  %v242_v31 = vand.u32 4294901760, %v3667_v52 }
  0x23   :  { %v208_v8 = vsub.f32 %v3624_v21, %v207_v4  ;;  %v3706_v9 = vpack.c.bf16 %v214_v5, %v207_v4  ;;  %v215_v10 = vsub.f32 %v3626_v22, %v214_v5  ;;  %v3713_v20 = vpack.c.bf16 %v228_v17, %v221_v16 }
  0x24   :  { %v3709_v11 = vpack.c.bf16 %v202_v7, %v195_v6  ;;  %v222_v23 = vsub.f32 %v3661_v49, %v221_v16  ;;  %v229_v24 = vsub.f32 %v3663_v50, %v228_v17  ;;  %v3723_v33 = vpack.c.bf16 %v242_v31, %v235_v29 }
  0x25   :  { %3117 = vmatpush3.bf16.msra.mxu0 %v3637_v30  ;;  %3045 = vmatpush3.bf16.msra.mxu1 %v3637_v30  ;;  %v209_v12 = vand.u32 4294901760, %v208_v8  ;;  %v216_v19 = vand.u32 4294901760, %v215_v10  ;;  %v236_v34 = vsub.f32 %v3665_v51, %v235_v29  ;;  %v243_v36 = vsub.f32 %v3667_v52, %v242_v31 }
  0x26   :  { %3118 = vmatprep.subr.bf16.mxu0 %v3569_v2  ;;  %3046 = vmatprep.subr.bf16.mxu1 %v3569_v2  ;;  %v223_v27 = vand.u32 4294901760, %v222_v23  ;;  %v230_v28 = vand.u32 4294901760, %v229_v24  ;;  %v249_v39 = vand.u32 4294901760, %v3669_v53  ;;  %v256_v41 = vand.u32 4294901760, %v3671_v54 }
  0x27   :  { %v3717_v26 = vpack.c.bf16 %v216_v19, %v209_v12  ;;  %v237_v37 = vand.u32 4294901760, %v236_v34  ;;  %v244_v38 = vand.u32 4294901760, %v243_v36  ;;  %v263_v62 = vand.u32 4294901760, %v3673_v55 }
  0x28   :  { %v3721_v32 = vpack.c.bf16 %v230_v28, %v223_v27  ;;  %v3731_v43 = vpack.c.bf16 %v256_v41, %v249_v39  ;;  %v250_v44 = vsub.f32 %v3669_v53, %v249_v39  ;;  %v257_v45 = vsub.f32 %v3671_v54, %v256_v41 }
  0x29   :  { %3120 = vmatpush3.bf16.msra.mxu0 %v3643_v35  ;;  %3048 = vmatpush3.bf16.msra.mxu1 %v3643_v35  ;;  %v3729_v42 = vpack.c.bf16 %v244_v38, %v237_v37  ;;  %v270_v1 = vand.u32 4294901760, %v3675_v56  ;;  %v264_v5 = vsub.f32 %v3673_v55, %v263_v62  ;;  %v277_v10 = vand.u32 4294901760, %v3678_v57 }
  0x2a   :  { %3121 = vmatprep.subr.bf16.mxu0 %v3569_v2  ;;  %3049 = vmatprep.subr.bf16.mxu1 %v3569_v2  ;;  %v251_v46 = vand.u32 4294901760, %v250_v44  ;;  %v258_v61 = vand.u32 4294901760, %v257_v45  ;;  %v284_v12 = vand.u32 4294901760, %v3680_v58  ;;  %v291_v28 = vand.u32 4294901760, %v3684_v59 }
  0x2b   :  { %v3739_v4 = vpack.c.bf16 %v270_v1, %v263_v62  ;;  %v271_v6 = vsub.f32 %v3675_v56, %v270_v1  ;;  %v265_v7 = vand.u32 4294901760, %v264_v5  ;;  %v278_v19 = vsub.f32 %v3678_v57, %v277_v10 }
  0x2c   :  { %v3737_v3 = vpack.c.bf16 %v258_v61, %v251_v46  ;;  %v3747_v17 = vpack.c.bf16 %v284_v12, %v277_v10  ;;  %v285_v23 = vsub.f32 %v3680_v58, %v284_v12  ;;  %v298_v29 = vand.u32 4294901760, %v3686_v60  ;;  %v2089_v12 = vld [vmem:[#allocation2 + $0x1] ss:$0 sm:$0xff] }
  0x2d   :  { %3123 = vmatpush3.bf16.msra.mxu0 %v3649_v40  ;;  %3051 = vmatpush3.bf16.msra.mxu1 %v3649_v40  ;;  %v272_v8 = vand.u32 4294901760, %v271_v6  ;;  %v279_v24 = vand.u32 4294901760, %v278_v19  ;;  %v292_v36 = vsub.f32 %v3684_v59, %v291_v28  ;;  %v3083_v44 = vpack.c.bf16 %v3617_v15, %v3615_v14  ;;  %v2090_v19 = vld [vmem:[#allocation2 + $0x8] ss:$0 sm:$0xff] }
  0x2e   :  { %3124 = vmatprep.subr.bf16.mxu0 %v3569_v2  ;;  %3052 = vmatprep.subr.bf16.mxu1 %v3569_v2  ;;  %v286_v27 = vand.u32 4294901760, %v285_v23  ;;  %v3755_v34 = vpack.c.bf16 %v298_v29, %v291_v28  ;;  %v299_v37 = vsub.f32 %v3686_v60, %v298_v29  ;;  %v3086_v45 = vpack.c.bf16 %v3626_v22, %v3624_v21  ;;  %v745_v21 = vld [vmem:[#allocation2 + $0x108] sm:$0xff]  ;;  %v746_v22 = vld [vmem:[#allocation2 + $0x110] sm:$0xff] }
  0x2f   :  { %v3745_v16 = vpack.c.bf16 %v272_v8, %v265_v7  ;;  %v293_v38 = vand.u32 4294901760, %v292_v36  ;;  %v3089_v46 = vpack.c.bf16 %v3663_v50, %v3661_v49  ;;  %v3092_v61 = vpack.c.bf16 %v3667_v52, %v3665_v51  ;;  %v2088_v7 = vld [vmem:[#allocation2] ss:$0 sm:$0xff] }
  0x30   :  { %v3753_v31 = vpack.c.bf16 %v286_v27, %v279_v24  ;;  %v300_v39 = vand.u32 4294901760, %v299_v37  ;;  %v2091_v24 = vld [vmem:[#allocation2 + $0x9] ss:$0 sm:$0xff]  ;;  %v4430_v14 = vpack.c.bf16 %v3675_v56, %v3673_v55  ;;  %v4431_v15 = vpack.c.bf16 %v3680_v58, %v3678_v57  ;;  %v748_v49 = vld [vmem:[#allocation2 + $0x120] sm:$0xff]  ;;  %v751_v58 = vld [vmem:[#allocation2 + $0x138] sm:$0xff] }
  0x31   :  { %3126 = vmatpush3.bf16.msra.mxu0 %v3655_v47  ;;  %3054 = vmatpush3.bf16.msra.mxu1 %v3655_v47  ;;  %v775_v51 = vand.u32 4294901760, %v748_v49 }
  0x32   :  { %3127 = vmatprep.subr.bf16.mxu0 %v3569_v2  ;;  %3055 = vmatprep.subr.bf16.mxu1 %v3569_v2  ;;  %v3759_v41 = vpack.c.bf16 %v300_v39, %v293_v38 }
  0x35   :  { %3129 = vmatpush3.bf16.msra.mxu0 %v3659_v48  ;;  %3057 = vmatpush3.bf16.msra.mxu1 %v3659_v48 }
  0x36   :  { %3130 = vmatprep.subr.bf16.mxu0 %v3569_v2  ;;  %3058 = vmatprep.subr.bf16.mxu1 %v3569_v2 }
  0x95   :  { %v41_v8 = vpop.permute.xlu0 %40  ;;  %v66_v23 = vpop.permute.xlu1 %65 }
  0x96   :  { %v47_v10 = vmul.f32 %v2088_v7, %v41_v8  ;;  %v72_v36 = vmul.f32 %v2091_v24, %v66_v23 }
  0x98   :  { %v52_v28 = vadd.f32 %v2089_v12, %v47_v10 }
  0x99   :  { %v56_v27 = vpop.permute.xlu0 %55 }
  0x9a   :  { %v62_v29 = vmul.f32 %v2090_v19, %v56_v27 }
  0x9c   :  { %v63_v37 = vadd.f32 %v62_v29, %v52_v28 }
  0x9e   :  { %v73_v38 = vadd.f32 %v72_v36, %v63_v37 }
  0xa0   :  { %v75_v39 = vmul.f32 1.442695, %v73_v38  ;;  %vm74_vm1 = vcmp.gt.f32.partialorder %v73_v38, 0.0 }
  0xa2   :  { %3510 = vpow2.f32 %v75_v39 }
  0xac   :  { %v3511_v1 = vpop.eup %3510 }
  0xad   :  { %v2092_v5 = vadd.f32 -1.0, %v3511_v1 }
  0xaf   :  { %v78_v62 = vsel %vm74_vm1, %v73_v38, %v2092_v5  ;;  %v759_v5 = vld [vmem:[#allocation2 + $0x178] sm:$0xff] }
  0xb0   :  { %v3777_v6 = vand.u32 4294901760, %v78_v62  ;;  %v808_v37 = vand.u32 4294901760, %v759_v5 }
  0xb2   :  { %v3780_v7 = vsub.f32 %v78_v62, %v3777_v6 }
  0xb4   :  { %v182_v8 = vand.u32 4294901760, %v3780_v7 }
  0xb6   :  { %2542 = vmatmul.mubr.f32.vlgmr.msra.gmra.mrb[0].mxu0 %v182_v8  ;;  %v183_v10 = vsub.f32 %v3780_v7, %v182_v8 }
  0xb7   :  { %3132 = vmatpush3.bf16.msra.mxu0 %v3696_v0  ;;  %2576 = vmatprep.mubr.msk.f32.mxu0 %vm3570_vm0, %v3571_v63 }
  0xb8   :  { %3133 = vmatprep.subr.bf16.mxu0 %v3569_v2  ;;  %v184_v1 = vand.u32 4294901760, %v183_v10  ;;  %v3940_v10 = vsub.f32 %v759_v5, %v808_v37 }
  0xba   :  { %2437 = vmatmul.mubr.f32.vlgmr.msra.gmra.mrb[0].mxu1 %v184_v1 }
  0xbb   :  { %3060 = vmatpush3.bf16.msra.mxu1 %v3709_v11  ;;  %3135 = vmatpush3.bf16.msra.mxu0 %v3706_v9  ;;  %v753_v11 = vld [vmem:[#allocation2 + $0x148] sm:$0xff] }
  0xbc   :  { %3061 = vmatprep.subr.bf16.mxu1 %v3569_v2  ;;  %3136 = vmatprep.subr.bf16.mxu0 %v3569_v2 }
  0xbd   :  { %2471 = vmatprep.mubr.msk.f32.mxu1 %vm3570_vm0, %v3571_v63 }
  0xbf   :  { %3063 = vmatpush3.bf16.msra.mxu1 %v3717_v26  ;;  %3138 = vmatpush3.bf16.msra.mxu0 %v3713_v20  ;;  %v754_v20 = vld [vmem:[#allocation2 + $0x150] sm:$0xff]  ;;  %v790_v26 = vand.u32 4294901760, %v753_v11 }
  0xc0   :  { %3064 = vmatprep.subr.bf16.mxu1 %v3569_v2  ;;  %3139 = vmatprep.subr.bf16.mxu0 %v3569_v2 }
  0xc1   :  { %v3923_v23 = vsub.f32 %v753_v11, %v790_v26 }
  0xc3   :  { %3066 = vmatpush3.bf16.msra.mxu1 %v3721_v32  ;;  %3141 = vmatpush3.bf16.msra.mxu0 %v3723_v33  ;;  %v793_v32 = vand.u32 4294901760, %v754_v20 }
  0xc4   :  { %3067 = vmatprep.subr.bf16.mxu1 %v3569_v2  ;;  %3142 = vmatprep.subr.bf16.mxu0 %v3569_v2 }
  0xc5   :  { %v3900_v33 = vpack.c.bf16 %v793_v32, %v790_v26  ;;  %v3925_v24 = vsub.f32 %v754_v20, %v793_v32 }
  0xc7   :  { %3069 = vmatpush3.bf16.msra.mxu1 %v3729_v42  ;;  %3144 = vmatpush3.bf16.msra.mxu0 %v3731_v43  ;;  %v755_v42 = vld [vmem:[#allocation2 + $0x158] sm:$0xff]  ;;  %v756_v43 = vld [vmem:[#allocation2 + $0x160] sm:$0xff] }
  0xc8   :  { %3070 = vmatprep.subr.bf16.mxu1 %v3569_v2  ;;  %3145 = vmatprep.subr.bf16.mxu0 %v3569_v2 }
  0xcb   :  { %3072 = vmatpush3.bf16.msra.mxu1 %v3737_v3  ;;  %3147 = vmatpush3.bf16.msra.mxu0 %v3739_v4  ;;  %v796_v3 = vand.u32 4294901760, %v755_v42  ;;  %v799_v4 = vand.u32 4294901760, %v756_v43 }
  0xcc   :  { %3073 = vmatprep.subr.bf16.mxu1 %v3569_v2  ;;  %3148 = vmatprep.subr.bf16.mxu0 %v3569_v2 }
  0xcd   :  { %v3928_v27 = vsub.f32 %v755_v42, %v796_v3  ;;  %v3930_v28 = vsub.f32 %v756_v43, %v799_v4  ;;  %v4421_v43 = vand.u32 4294901760, %v3923_v23 }
  0xcf   :  { %3075 = vmatpush3.bf16.msra.mxu1 %v3745_v16  ;;  %3150 = vmatpush3.bf16.msra.mxu0 %v3747_v17  ;;  %v3904_v16 = vpack.c.bf16 %v799_v4, %v796_v3  ;;  %v757_v17 = vld [vmem:[#allocation2 + $0x168] sm:$0xff]  ;;  %v4420_v3 = vand.u32 4294901760, %v3925_v24  ;;  %v4419_v5 = vand.u32 4294901760, %v3928_v27 }
  0xd0   :  { %3076 = vmatprep.subr.bf16.mxu1 %v3569_v2  ;;  %3151 = vmatprep.subr.bf16.mxu0 %v3569_v2 }
  0xd3   :  { %3078 = vmatpush3.bf16.msra.mxu1 %v3753_v31  ;;  %3153 = vmatpush3.bf16.msra.mxu0 %v3755_v34  ;;  %v758_v31 = vld [vmem:[#allocation2 + $0x170] sm:$0xff]  ;;  %v802_v34 = vand.u32 4294901760, %v757_v17 }
  0xd4   :  { %3079 = vmatprep.subr.bf16.mxu1 %v3569_v2  ;;  %3154 = vmatprep.subr.bf16.mxu0 %v3569_v2 }
  0xd5   :  { %v3932_v29 = vsub.f32 %v757_v17, %v802_v34  ;;  %v916_v17 = vsub.f32 %v3923_v23, %v4421_v43 }
  0xd6   :  { %2577 = vmatmul.mubr.f32.vlgmr.msra.gmra.mrb[0].mxu0 %v3777_v6 }
  0xd7   :  { %3081 = vmatpush3.bf16.msra.mxu1 %v3759_v41  ;;  %3156 = vmatpush3.bf16.msra.mxu0 %v3613_v13  ;;  %v4429_v13 = vpack.c.bf16 %v3671_v54, %v3669_v53  ;;  %v749_v53 = vld [vmem:[#allocation2 + $0x128] sm:$0xff]  ;;  %v750_v54 = vld [vmem:[#allocation2 + $0x130] sm:$0xff]  ;;  %v805_v41 = vand.u32 4294901760, %v758_v31 }
  0xd8   :  { %3082 = vmatprep.subr.bf16.mxu1 %v3569_v2  ;;  %3157 = vmatprep.subr.bf16.mxu0 %v3569_v2  ;;  %v778_v55 = vand.u32 4294901760, %v749_v53  ;;  %v781_v56 = vand.u32 4294901760, %v750_v54 }
  0xd9   :  { %2611 = vmatprep.mubr.msk.f32.mxu0 %vm3570_vm0, %v3571_v63  ;;  %v3934_v36 = vsub.f32 %v758_v31, %v805_v41  ;;  %v923_v31 = vsub.f32 %v3925_v24, %v4420_v3 }
  0xda   :  { %2472 = vmatmul.mubr.f32.vlgmr.msra.gmra.mrb[0].mxu1 %v3777_v6  ;;  %v3892_v57 = vpack.c.bf16 %v781_v56, %v778_v55  ;;  %v3916_v62 = vsub.f32 %v750_v54, %v781_v56 }
  0xdb   :  { %3084 = vmatpush3.bf16.msra.mxu1 %v3083_v44  ;;  %3159 = vmatpush3.bf16.msra.mxu0 %v3621_v18  ;;  %v4432_v18 = vpack.c.bf16 %v3686_v60, %v3684_v59  ;;  %v752_v59 = vld [vmem:[#allocation2 + $0x140] sm:$0xff]  ;;  %v784_v60 = vand.u32 4294901760, %v751_v58  ;;  %v3908_v44 = vpack.c.bf16 %v805_v41, %v802_v34  ;;  %v917_v34 = vand.u32 4294901760, %v916_v17 }
  0xdc   :  { %3085 = vmatprep.subr.bf16.mxu1 %v3569_v2  ;;  %3160 = vmatprep.subr.bf16.mxu0 %v3569_v2  ;;  %v787_v0 = vand.u32 4294901760, %v752_v59  ;;  %v924_v41 = vand.u32 4294901760, %v923_v31 }
  0xdd   :  { %2506 = vmatprep.mubr.msk.f32.mxu1 %vm3570_vm0, %v3571_v63  ;;  %v3919_v12 = vsub.f32 %v751_v58, %v784_v60 }
  0xde   :  { %v3896_v9 = vpack.c.bf16 %v787_v0, %v784_v60  ;;  %v3921_v19 = vsub.f32 %v752_v59, %v787_v0 }
  0xdf   :  { %3087 = vmatpush3.bf16.msra.mxu1 %v3086_v45  ;;  %3162 = vmatpush3.bf16.msra.mxu0 %v3631_v25  ;;  %v766_v25 = vand.u32 4294901760, %v745_v21  ;;  %v901_v60 = vand.u32 4294901760, %v3919_v12 }
  0xe0   :  { %3088 = vmatprep.subr.bf16.mxu1 %v3569_v2  ;;  %3163 = vmatprep.subr.bf16.mxu0 %v3569_v2  ;;  %v908_v0 = vand.u32 4294901760, %v3921_v19 }
  0xe1   :  { %v902_v20 = vsub.f32 %v3919_v12, %v901_v60 }
  0xe2   :  { %v909_v26 = vsub.f32 %v3921_v19, %v908_v0 }
  0xe3   :  { %3090 = vmatpush3.bf16.msra.mxu1 %v3089_v46  ;;  %3165 = vmatpush3.bf16.msra.mxu0 %v3637_v30  ;;  %v769_v30 = vand.u32 4294901760, %v746_v22  ;;  %v3912_v46 = vsub.f32 %v748_v49, %v775_v51  ;;  %v894_v49 = vand.u32 4294901760, %v3916_v62  ;;  %v903_v32 = vand.u32 4294901760, %v902_v20 }
  0xe4   :  { %3091 = vmatprep.subr.bf16.mxu1 %v3569_v2  ;;  %3166 = vmatprep.subr.bf16.mxu0 %v3569_v2  ;;  %v910_v42 = vand.u32 4294901760, %v909_v26 }
  0xe6   :  { %v3212_v4 = vpack.c.bf16 %v910_v42, %v903_v32 }
  0xe7   :  { %3093 = vmatpush3.bf16.msra.mxu1 %v3092_v61  ;;  %3168 = vmatpush3.bf16.msra.mxu0 %v3643_v35  ;;  %v3880_v35 = vpack.c.bf16 %v769_v30, %v766_v25  ;;  %v3914_v61 = vsub.f32 %v749_v53, %v778_v55  ;;  %v895_v55 = vsub.f32 %v3916_v62, %v894_v49 }
  0xe8   :  { %3094 = vmatprep.subr.bf16.mxu1 %v3569_v2  ;;  %3169 = vmatprep.subr.bf16.mxu0 %v3569_v2 }
  0xe9   :  { %v896_v59 = vand.u32 4294901760, %v895_v55 }
  0xeb   :  { %3096 = vmatpush3.bf16.msra.mxu1 %v4429_v13  ;;  %3171 = vmatpush3.bf16.msra.mxu0 %v3649_v40  ;;  %v3882_v40 = vsub.f32 %v745_v21, %v766_v25 }
  0xec   :  { %3097 = vmatprep.subr.bf16.mxu1 %v3569_v2  ;;  %3172 = vmatprep.subr.bf16.mxu0 %v3569_v2 }
  0xed   :  { %v859_v39 = vand.u32 4294901760, %v3882_v40 }
  0xef   :  { %3099 = vmatpush3.bf16.msra.mxu1 %v4430_v14  ;;  %3174 = vmatpush3.bf16.msra.mxu0 %v3655_v47  ;;  %v3884_v47 = vsub.f32 %v746_v22, %v769_v30  ;;  %v860_v13 = vsub.f32 %v3882_v40, %v859_v39 }
  0xf0   :  { %3100 = vmatprep.subr.bf16.mxu1 %v3569_v2  ;;  %3175 = vmatprep.subr.bf16.mxu0 %v3569_v2 }
  0xf1   :  { %v861_v21 = vand.u32 4294901760, %v860_v13 }
  0xf3   :  { %3102 = vmatpush3.bf16.msra.mxu1 %v4431_v15  ;;  %3177 = vmatpush3.bf16.msra.mxu0 %v3659_v48  ;;  %v747_v48 = vld [vmem:[#allocation2 + $0x118] sm:$0xff] }
  0xf4   :  { %3103 = vmatprep.subr.bf16.mxu1 %v3569_v2  ;;  %3322 = vmatprep.subr.bf16.mxu0 %v3569_v2  ;;  %v772_v50 = vand.u32 4294901760, %v747_v48 }
  0xf6   :  { %2612 = vmatmul.mubr.f32.vlgmr.msra.gmra.mrb[0].mxu0 %v3777_v6  ;;  %v3888_v52 = vpack.c.bf16 %v775_v51, %v772_v50  ;;  %v3910_v45 = vsub.f32 %v747_v48, %v772_v50  ;;  %v760_v6 = vld [vmem:[#allocation2 + $0x180] sm:$0xff]  ;;  %v887_v48 = vand.u32 4294901760, %v3914_v61 }
  0xf7   :  { %3105 = vmatpush3.bf16.msra.mxu1 %v4432_v18  ;;  %2856 = vmatprep.mubr.msk.f32.mxu0 %vm3570_vm0, %v3571_v63  ;;  %v811_v38 = vand.u32 4294901760, %v760_v6  ;;  %v880_v18 = vand.u32 4294901760, %v3912_v46 }
  0xf8   :  { %3178 = vmatprep.subr.bf16.mxu1 %v3569_v2  ;;  %v873_v15 = vand.u32 4294901760, %v3910_v45  ;;  %v888_v54 = vsub.f32 %v3914_v61, %v887_v48 }
  0xf9   :  { %v3938_v8 = vpack.c.bf16 %v811_v38, %v808_v37  ;;  %v3942_v1 = vsub.f32 %v760_v6, %v811_v38  ;;  %v881_v30 = vsub.f32 %v3912_v46, %v880_v18  ;;  %v4418_v6 = vand.u32 4294901760, %v3930_v28 }
  0xfa   :  { %2507 = vmatmul.mubr.f32.vlgmr.msra.gmra.mrb[0].mxu1 %v3780_v7  ;;  %v866_v7 = vand.u32 4294901760, %v3884_v47  ;;  %v874_v25 = vsub.f32 %v3910_v45, %v873_v15  ;;  %v889_v58 = vand.u32 4294901760, %v888_v54  ;;  %v3215_v37 = vpack.c.bf16 %v924_v41, %v917_v34 }
  0xfb   :  { %2646 = vmatprep.mubr.msk.f32.mxu1 %vm3570_vm0, %v3571_v63  ;;  %3180 = vmatpush3.bf16.msra.mxu1 %v3880_v35  ;;  %v882_v53 = vand.u32 4294901760, %v881_v30  ;;  %v930_v38 = vsub.f32 %v3928_v27, %v4419_v5  ;;  %v937_v13 = vsub.f32 %v3930_v28, %v4418_v6  ;;  %v3227_v34 = vpack.c.bf16 %v3884_v47, %v3882_v40 }
  0xfc   :  { %3181 = vmatprep.subr.bf16.mxu1 %v3569_v2  ;;  %v867_v14 = vsub.f32 %v3884_v47, %v866_v7  ;;  %v875_v51 = vand.u32 4294901760, %v874_v25  ;;  %v3974_v11 = vpack.c.bf16 %v896_v59, %v889_v58  ;;  %v4416_v25 = vand.u32 4294901760, %v3934_v36 }
  0xfd   :  { %v4415_v58 = vand.u32 4294901760, %v3940_v10  ;;  %v4414_v59 = vand.u32 4294901760, %v3942_v1  ;;  %v3230_v41 = vpack.c.bf16 %v3912_v46, %v3910_v45  ;;  %v3281_v40 = vpack.c.bf16 %v894_v49, %v887_v48  ;;  %v1419_v49 = vld [vmem:[#allocation2 + $0x1c8] sm:$0xff] }
  0xfe   :  { %v868_v22 = vand.u32 4294901760, %v867_v14  ;;  %v3970_v56 = vpack.c.bf16 %v882_v53, %v875_v51  ;;  %v931_v14 = vand.u32 4294901760, %v930_v38  ;;  %v951_v53 = vsub.f32 %v3934_v36, %v4416_v25 }
  0xff   :  { %3183 = vmatpush3.bf16.msra.mxu1 %v3888_v52  ;;  %v958_v26 = vsub.f32 %v3940_v10, %v4415_v58  ;;  %v965_v32 = vsub.f32 %v3942_v1, %v4414_v59  ;;  %v3233_v38 = vpack.c.bf16 %v3916_v62, %v3914_v61  ;;  %v3284_v47 = vpack.c.bf16 %v908_v0, %v901_v60  ;;  %v1420_v60 = vld [vmem:[#allocation2 + $0x1d0] sm:$0xff] }
 0x100   :  { %3184 = vmatprep.subr.bf16.mxu1 %v3569_v2  ;;  %v3962_v50 = vpack.c.bf16 %v868_v22, %v861_v21  ;;  %v938_v21 = vand.u32 4294901760, %v937_v13  ;;  %v4417_v22 = vand.u32 4294901760, %v3932_v29  ;;  %v952_v55 = vand.u32 4294901760, %v951_v53 }
 0x101   :  { %v959_v42 = vand.u32 4294901760, %v958_v26  ;;  %v966_v17 = vand.u32 4294901760, %v965_v32  ;;  %v3236_v13 = vpack.c.bf16 %v3921_v19, %v3919_v12  ;;  %v3248_v53 = vpack.c.bf16 %v3942_v1, %v3940_v10  ;;  %v2093_v26 = vld [vmem:[#allocation2 + $0x2] ss:$0 sm:$0xff] }
 0x102   :  { %v3218_v30 = vpack.c.bf16 %v938_v21, %v931_v14  ;;  %v944_v51 = vsub.f32 %v3932_v29, %v4417_v22  ;;  %v3239_v14 = vpack.c.bf16 %v3925_v24, %v3923_v23  ;;  %v3242_v21 = vpack.c.bf16 %v3930_v28, %v3928_v27 }
 0x103   :  { %3186 = vmatpush3.bf16.msra.mxu1 %v3892_v57  ;;  %v3224_v31 = vpack.c.bf16 %v966_v17, %v959_v42  ;;  %v4433_v45 = vand.u32 4294901760, %v3923_v23  ;;  %v4434_v46 = vand.u32 4294901760, %v3925_v24  ;;  %v4435_v61 = vand.u32 4294901760, %v3928_v27 }
 0x104   :  { %3187 = vmatprep.subr.bf16.mxu1 %v3569_v2  ;;  %v945_v54 = vand.u32 4294901760, %v944_v51  ;;  %v3245_v51 = vpack.c.bf16 %v3934_v36, %v3932_v29  ;;  %v4436_v62 = vand.u32 4294901760, %v3930_v28  ;;  %v4437_v12 = vand.u32 4294901760, %v3932_v29  ;;  %v1416_v28 = vld [vmem:[#allocation2 + $0x1b0] sm:$0xff] }
 0x105   :  { %v4438_v19 = vand.u32 4294901760, %v3934_v36  ;;  %v4439_v23 = vand.u32 4294901760, %v3940_v10  ;;  %v4440_v24 = vand.u32 4294901760, %v3942_v1  ;;  %v1447_v29 = vand.u32 4294901760, %v1416_v28  ;;  %v1417_v36 = vld [vmem:[#allocation2 + $0x1b8] sm:$0xff] }
 0x106   :  { %v3221_v20 = vpack.c.bf16 %v952_v55, %v945_v54  ;;  %v1450_v10 = vand.u32 4294901760, %v1417_v36  ;;  %v1456_v0 = vand.u32 4294901760, %v1419_v49 }
 0x107   :  { %3189 = vmatpush3.bf16.msra.mxu1 %v3896_v9 }
 0x108   :  { %3190 = vmatprep.subr.bf16.mxu1 %v3569_v2 }
 0x10b   :  { %3192 = vmatpush3.bf16.msra.mxu1 %v3900_v33 }
 0x10c   :  { %3193 = vmatprep.subr.bf16.mxu1 %v3569_v2 }
 0x10f   :  { %3195 = vmatpush3.bf16.msra.mxu1 %v3904_v16 }
 0x110   :  { %3196 = vmatprep.subr.bf16.mxu1 %v3569_v2 }
 0x113   :  { %3198 = vmatpush3.bf16.msra.mxu1 %v3908_v44 }
 0x114   :  { %3199 = vmatprep.subr.bf16.mxu1 %v3569_v2 }
 0x117   :  { %3201 = vmatpush3.bf16.msra.mxu1 %v3938_v8 }
 0x118   :  { %3202 = vmatprep.subr.bf16.mxu1 %v3569_v2 }
 0x1c9   :  { %v736_v54 = vpop.f32.mrb[0].mxu0 }
 0x1ca   :  { %v2613_v55 = vpop.f32.mrb[1].mxu0 }
 0x1cd   :  { %v441_v32 = vpop.f32.mrb[0].mxu1 }
 0x1ce   :  { %v3466_v42 = vadd.f32 %v2093_v26, %v441_v32  ;;  %v2508_v17 = vpop.f32.mrb[1].mxu1  ;;  %v1425_v32 = vld [vmem:[#allocation2 + $0x1f8] sm:$0xff] }
 0x1cf   :  { %v4184_v17 = vsub.f32 %v1417_v36, %v1450_v10 }
 0x1d0   :  { %v3467_v59 = vadd.f32 %v3466_v42, %v736_v54  ;;  %v4181_v54 = vsub.f32 %v1416_v28, %v1447_v29  ;;  %v1426_v42 = vld [vmem:[#allocation2 + $0x200] sm:$0xff] }
 0x1d2   :  { %v741_v58 = vmul.f32 1.442695, %v3467_v59  ;;  %vm740_vm2 = vcmp.gt.f32.partialorder %v3467_v59, 0.0 }
 0x1d4   :  { %3512 = vpow2.f32 %v741_v58  ;;  %v1422_v58 = vld [vmem:[#allocation2 + $0x1e0] sm:$0xff] }
 0x1de   :  { %v3513_v25 = vpop.eup %3512 }
 0x1df   :  { %v2094_v22 = vadd.f32 -1.0, %v3513_v25  ;;  %v3275_v25 = vpack.c.bf16 %v866_v7, %v859_v39  ;;  %v3287_v39 = vpack.c.bf16 %v4434_v46, %v4433_v45  ;;  %v3290_v7 = vpack.c.bf16 %v4436_v62, %v4435_v61 }
 0x1e1   :  { %v744_v6 = vsel %vm740_vm2, %v3467_v59, %v2094_v22 }
 0x1e2   :  { %v4030_v5 = vand.u32 4294901760, %v744_v6 }
 0x1e4   :  { %v4033_v3 = vsub.f32 %v744_v6, %v4030_v5 }
 0x1e6   :  { %v848_v43 = vand.u32 4294901760, %v4033_v3 }
 0x1e8   :  { %v849_v55 = vsub.f32 %v4033_v3, %v848_v43 }
 0x1ea   :  { %v850_v26 = vand.u32 4294901760, %v849_v55 }
 0x1ec   :  { %2647 = vmatmul.mubr.f32.vlgmr.msra.gmra.mrb[2].mxu1 %v850_v26  ;;  %v4188_v26 = vsub.f32 %v1419_v49, %v1456_v0 }
 0x1ed   :  { %3204 = vmatpush3.bf16.msra.mxu1 %v3962_v50  ;;  %2681 = vmatprep.mubr.msk.f32.mxu1 %vm3570_vm0, %v3571_v63  ;;  %v1411_v50 = vld [vmem:[#allocation2 + $0x188] sm:$0xff] }
 0x1ee   :  { %3205 = vmatprep.subr.bf16.mxu1 %v3569_v2 }
 0x1f1   :  { %3207 = vmatpush3.bf16.msra.mxu1 %v3970_v56  ;;  %v1412_v56 = vld [vmem:[#allocation2 + $0x190] sm:$0xff] }
 0x1f2   :  { %3208 = vmatprep.subr.bf16.mxu1 %v3569_v2 }
 0x1f5   :  { %3210 = vmatpush3.bf16.msra.mxu1 %v3974_v11  ;;  %v1432_v11 = vand.u32 4294901760, %v1411_v50 }
 0x1f6   :  { %3211 = vmatprep.subr.bf16.mxu1 %v3569_v2 }
 0x1f9   :  { %3213 = vmatpush3.bf16.msra.mxu1 %v3212_v4  ;;  %v1435_v4 = vand.u32 4294901760, %v1412_v56 }
 0x1fa   :  { %3214 = vmatprep.subr.bf16.mxu1 %v3569_v2 }
 0x1fb   :  { %v4056_v6 = vpack.c.bf16 %v1435_v4, %v1432_v11  ;;  %v4060_v22 = vsub.f32 %v1412_v56, %v1435_v4 }
 0x1fd   :  { %3216 = vmatpush3.bf16.msra.mxu1 %v3215_v37  ;;  %v4058_v37 = vsub.f32 %v1411_v50, %v1432_v11  ;;  %3324 = vmatpush3.bf16.msra.mxu0 %v4056_v6  ;;  %v1532_v45 = vand.u32 4294901760, %v4060_v22 }
 0x1fe   :  { %3217 = vmatprep.subr.bf16.mxu1 %v3569_v2  ;;  %3325 = vmatprep.subr.bf16.mxu0 %v3569_v2 }
 0x201   :  { %3219 = vmatpush3.bf16.msra.mxu1 %v3218_v30  ;;  %v3278_v30 = vpack.c.bf16 %v880_v18, %v873_v15  ;;  %v3293_v15 = vpack.c.bf16 %v4438_v19, %v4437_v12  ;;  %v3296_v18 = vpack.c.bf16 %v4440_v24, %v4439_v23 }
 0x202   :  { %3220 = vmatprep.subr.bf16.mxu1 %v3569_v2 }
 0x205   :  { %3222 = vmatpush3.bf16.msra.mxu1 %v3221_v20  ;;  %v1465_v20 = vand.u32 4294901760, %v1422_v58 }
 0x206   :  { %3223 = vmatprep.subr.bf16.mxu1 %v3569_v2 }
 0x207   :  { %v4195_v11 = vsub.f32 %v1422_v58, %v1465_v20  ;;  %v1581_v58 = vand.u32 4294901760, %v4188_v26 }
 0x209   :  { %3225 = vmatpush3.bf16.msra.mxu1 %v3224_v31 }
 0x20a   :  { %3226 = vmatprep.subr.bf16.mxu1 %v3569_v2 }
 0x20c   :  { %2682 = vmatmul.mubr.f32.vlgmr.msra.gmra.mrb[2].mxu1 %v4030_v5 }
 0x20d   :  { %3228 = vmatpush3.bf16.msra.mxu1 %v3227_v34  ;;  %2716 = vmatprep.mubr.msk.f32.mxu1 %vm3570_vm0, %v3571_v63  ;;  %v1423_v34 = vld [vmem:[#allocation2 + $0x1e8] sm:$0xff] }
 0x20e   :  { %3229 = vmatprep.subr.bf16.mxu1 %v3569_v2 }
 0x211   :  { %3231 = vmatpush3.bf16.msra.mxu1 %v3230_v41  ;;  %v1424_v41 = vld [vmem:[#allocation2 + $0x1f0] sm:$0xff] }
 0x212   :  { %3232 = vmatprep.subr.bf16.mxu1 %v3569_v2 }
 0x215   :  { %3234 = vmatpush3.bf16.msra.mxu1 %v3233_v38  ;;  %v1468_v38 = vand.u32 4294901760, %v1423_v34 }
 0x216   :  { %3235 = vmatprep.subr.bf16.mxu1 %v3569_v2 }
 0x217   :  { %v4197_v4 = vsub.f32 %v1423_v34, %v1468_v38  ;;  %v1582_v34 = vsub.f32 %v4188_v26, %v1581_v58 }
 0x219   :  { %3237 = vmatpush3.bf16.msra.mxu1 %v3236_v13  ;;  %v1471_v13 = vand.u32 4294901760, %v1424_v41 }
 0x21a   :  { %3238 = vmatprep.subr.bf16.mxu1 %v3569_v2 }
 0x21d   :  { %3240 = vmatpush3.bf16.msra.mxu1 %v3239_v14  ;;  %v4173_v14 = vpack.c.bf16 %v1471_v13, %v1468_v38  ;;  %v1583_v38 = vand.u32 4294901760, %v1582_v34 }
 0x21e   :  { %3241 = vmatprep.subr.bf16.mxu1 %v3569_v2 }
 0x221   :  { %3243 = vmatpush3.bf16.msra.mxu1 %v3242_v21 }
 0x222   :  { %3244 = vmatprep.subr.bf16.mxu1 %v3569_v2 }
 0x225   :  { %3246 = vmatpush3.bf16.msra.mxu1 %v3245_v51 }
 0x226   :  { %3247 = vmatprep.subr.bf16.mxu1 %v3569_v2 }
 0x229   :  { %3249 = vmatpush3.bf16.msra.mxu1 %v3248_v53 }
 0x22a   :  { %3250 = vmatprep.subr.bf16.mxu1 %v3569_v2 }
 0x22c   :  { %2717 = vmatmul.mubr.f32.vlgmr.msra.gmra.mrb[2].mxu1 %v4033_v3 }
 0x22d   :  { %3252 = vmatpush3.bf16.msra.mxu1 %v3880_v35  ;;  %2751 = vmatprep.mubr.msk.f32.mxu1 %vm3570_vm0, %v3571_v63 }
 0x22e   :  { %3253 = vmatprep.subr.bf16.mxu1 %v3569_v2 }
 0x231   :  { %3255 = vmatpush3.bf16.msra.mxu1 %v3888_v52 }
 0x232   :  { %3256 = vmatprep.subr.bf16.mxu1 %v3569_v2 }
 0x235   :  { %3258 = vmatpush3.bf16.msra.mxu1 %v3892_v57 }
 0x236   :  { %3259 = vmatprep.subr.bf16.mxu1 %v3569_v2 }
 0x239   :  { %3261 = vmatpush3.bf16.msra.mxu1 %v3896_v9 }
 0x23a   :  { %3262 = vmatprep.subr.bf16.mxu1 %v3569_v2 }
 0x23d   :  { %3264 = vmatpush3.bf16.msra.mxu1 %v3900_v33 }
 0x23e   :  { %3265 = vmatprep.subr.bf16.mxu1 %v3569_v2 }
 0x241   :  { %3267 = vmatpush3.bf16.msra.mxu1 %v3904_v16 }
 0x242   :  { %3268 = vmatprep.subr.bf16.mxu1 %v3569_v2 }
 0x245   :  { %3270 = vmatpush3.bf16.msra.mxu1 %v3908_v44 }
 0x246   :  { %3271 = vmatprep.subr.bf16.mxu1 %v3569_v2 }
 0x249   :  { %3273 = vmatpush3.bf16.msra.mxu1 %v3938_v8 }
 0x24a   :  { %3274 = vmatprep.subr.bf16.mxu1 %v3569_v2 }
 0x24c   :  { %2752 = vmatmul.mubr.f32.vlgmr.msra.gmra.mrb[2].mxu1 %v848_v43  ;;  %v1459_v43 = vand.u32 4294901760, %v1420_v60 }
 0x24d   :  { %3276 = vmatpush3.bf16.msra.mxu1 %v3275_v25  ;;  %2786 = vmatprep.mubr.msk.f32.mxu1 %vm3570_vm0, %v3571_v63  ;;  %v4199_v25 = vsub.f32 %v1424_v41, %v1471_v13 }
 0x24e   :  { %3277 = vmatprep.subr.bf16.mxu1 %v3569_v2  ;;  %v4165_v3 = vpack.c.bf16 %v1459_v43, %v1456_v0  ;;  %v4190_v50 = vsub.f32 %v1420_v60, %v1459_v43 }
 0x251   :  { %3279 = vmatpush3.bf16.msra.mxu1 %v3278_v30  ;;  %v1474_v30 = vand.u32 4294901760, %v1425_v32 }
 0x252   :  { %3280 = vmatprep.subr.bf16.mxu1 %v3569_v2 }
 0x255   :  { %3282 = vmatpush3.bf16.msra.mxu1 %v3281_v40  ;;  %v1477_v40 = vand.u32 4294901760, %v1426_v42 }
 0x256   :  { %3283 = vmatprep.subr.bf16.mxu1 %v3569_v2 }
 0x257   :  { %v4203_v46 = vpack.c.bf16 %v1477_v40, %v1474_v30  ;;  %v4207_v61 = vsub.f32 %v1426_v42, %v1477_v40  ;;  %v4426_v42 = vand.u32 4294901760, %v4195_v11 }
 0x259   :  { %3285 = vmatpush3.bf16.msra.mxu1 %v3284_v47  ;;  %v1525_v47 = vand.u32 4294901760, %v4058_v37 }
 0x25a   :  { %3286 = vmatprep.subr.bf16.mxu1 %v3569_v2 }
 0x25b   :  { %v1526_v62 = vsub.f32 %v4058_v37, %v1525_v47 }
 0x25d   :  { %3288 = vmatpush3.bf16.msra.mxu1 %v3287_v39  ;;  %v4205_v39 = vsub.f32 %v1425_v32, %v1474_v30 }
 0x25e   :  { %3289 = vmatprep.subr.bf16.mxu1 %v3569_v2 }
 0x261   :  { %3291 = vmatpush3.bf16.msra.mxu1 %v3290_v7  ;;  %v1533_v7 = vsub.f32 %v4060_v22, %v1532_v45 }
 0x262   :  { %3292 = vmatprep.subr.bf16.mxu1 %v3569_v2 }
 0x263   :  { %v1534_v23 = vand.u32 4294901760, %v1533_v7 }
 0x265   :  { %3294 = vmatpush3.bf16.msra.mxu1 %v3293_v15  ;;  %v1527_v15 = vand.u32 4294901760, %v1526_v62  ;;  %v1603_v62 = vsub.f32 %v4195_v11, %v4426_v42 }
 0x266   :  { %3295 = vmatprep.subr.bf16.mxu1 %v3569_v2 }
 0x269   :  { %3297 = vmatpush3.bf16.msra.mxu1 %v3296_v18 }
 0x26a   :  { %3298 = vmatprep.subr.bf16.mxu1 %v3569_v2 }
 0x26c   :  { %2787 = vmatmul.mubr.f32.vlgmr.msra.gmra.mrb[2].mxu1 %v4030_v5 }
 0x26d   :  { %3300 = vmatpush3.bf16.msra.mxu1 %v3880_v35  ;;  %2821 = vmatprep.mubr.msk.f32.mxu1 %vm3570_vm0, %v3571_v63  ;;  %v1413_v35 = vld [vmem:[#allocation2 + $0x198] sm:$0xff] }
 0x26e   :  { %3301 = vmatprep.subr.bf16.mxu1 %v3569_v2 }
 0x271   :  { %3303 = vmatpush3.bf16.msra.mxu1 %v3888_v52  ;;  %v1414_v52 = vld [vmem:[#allocation2 + $0x1a0] sm:$0xff] }
 0x272   :  { %3304 = vmatprep.subr.bf16.mxu1 %v3569_v2 }
 0x275   :  { %3306 = vmatpush3.bf16.msra.mxu1 %v3892_v57  ;;  %v1438_v57 = vand.u32 4294901760, %v1413_v35 }
 0x276   :  { %3307 = vmatprep.subr.bf16.mxu1 %v3569_v2 }
 0x277   :  { %v4175_v21 = vsub.f32 %v1413_v35, %v1438_v57 }
 0x279   :  { %3309 = vmatpush3.bf16.msra.mxu1 %v3896_v9  ;;  %v1441_v9 = vand.u32 4294901760, %v1414_v52  ;;  %v1539_v12 = vand.u32 4294901760, %v4175_v21 }
 0x27a   :  { %3310 = vmatprep.subr.bf16.mxu1 %v3569_v2 }
 0x27b   :  { %v4153_v27 = vpack.c.bf16 %v1441_v9, %v1438_v57  ;;  %v4177_v51 = vsub.f32 %v1414_v52, %v1441_v9  ;;  %v1540_v24 = vsub.f32 %v4175_v21, %v1539_v12  ;;  %v1560_v52 = vand.u32 4294901760, %v4181_v54 }
 0x27c   :  { %v4227_v57 = vpack.c.bf16 %v1534_v23, %v1527_v15  ;;  %v1604_v15 = vand.u32 4294901760, %v1603_v62  ;;  %v4425_v23 = vand.u32 4294901760, %v4197_v4 }
 0x27d   :  { %3312 = vmatpush3.bf16.msra.mxu1 %v3900_v33  ;;  %v1415_v33 = vld [vmem:[#allocation2 + $0x1a8] sm:$0xff]  ;;  %3327 = vmatpush3.bf16.msra.mxu0 %v4153_v27  ;;  %v1546_v19 = vand.u32 4294901760, %v4177_v51  ;;  %v1541_v9 = vand.u32 4294901760, %v1540_v24  ;;  %v4424_v24 = vand.u32 4294901760, %v4199_v25 }
 0x27e   :  { %3313 = vmatprep.subr.bf16.mxu1 %v3569_v2  ;;  %3328 = vmatprep.subr.bf16.mxu0 %v3569_v2 }
 0x27f   :  { %v1547_v18 = vsub.f32 %v4177_v51, %v1546_v19 }
 0x281   :  { %3315 = vmatpush3.bf16.msra.mxu1 %v3904_v16  ;;  %v1444_v16 = vand.u32 4294901760, %v1415_v33 }
 0x282   :  { %3316 = vmatprep.subr.bf16.mxu1 %v3569_v2 }
 0x283   :  { %v4179_v53 = vsub.f32 %v1415_v33, %v1444_v16  ;;  %v1548_v33 = vand.u32 4294901760, %v1547_v18 }
 0x285   :  { %3318 = vmatpush3.bf16.msra.mxu1 %v3908_v44  ;;  %v4157_v44 = vpack.c.bf16 %v1447_v29, %v1444_v16  ;;  %v1553_v35 = vand.u32 4294901760, %v4179_v53  ;;  %v1561_v16 = vsub.f32 %v4181_v54, %v1560_v52  ;;  %v4235_v29 = vpack.c.bf16 %v1548_v33, %v1541_v9 }
 0x286   :  { %3319 = vmatprep.subr.bf16.mxu1 %v3569_v2  ;;  %v1610_v9 = vsub.f32 %v4197_v4, %v4425_v23  ;;  %v1617_v33 = vsub.f32 %v4199_v25, %v4424_v24 }
 0x287   :  { %3330 = vmatpush3.bf16.msra.mxu0 %v4157_v44  ;;  %v1554_v28 = vsub.f32 %v4179_v53, %v1553_v35 }
 0x288   :  { %3331 = vmatprep.subr.bf16.mxu0 %v3569_v2 }
 0x289   :  { %3321 = vmatpush3.bf16.msra.mxu1 %v3938_v8  ;;  %v1418_v8 = vld [vmem:[#allocation2 + $0x1c0] sm:$0xff]  ;;  %v1555_v36 = vand.u32 4294901760, %v1554_v28  ;;  %v1611_v28 = vand.u32 4294901760, %v1610_v9  ;;  %v3389_v9 = vpack.c.bf16 %v4199_v25, %v4197_v4 }
 0x28a   :  { %v1453_v1 = vand.u32 4294901760, %v1418_v8 }
 0x28c   :  { %2822 = vmatmul.mubr.f32.vlgmr.msra.gmra.mrb[2].mxu1 %v4030_v5  ;;  %v4161_v48 = vpack.c.bf16 %v1453_v1, %v1450_v10  ;;  %v1421_v5 = vld [vmem:[#allocation2 + $0x1d8] sm:$0xff]  ;;  %v4186_v55 = vsub.f32 %v1418_v8, %v1453_v1  ;;  %v1562_v8 = vand.u32 4294901760, %v1561_v16  ;;  %v1567_v10 = vand.u32 4294901760, %v4184_v17 }
 0x28d   :  { %v1462_v59 = vand.u32 4294901760, %v1421_v5  ;;  %v1618_v16 = vand.u32 4294901760, %v1617_v33  ;;  %v3392_v33 = vpack.c.bf16 %v4207_v61, %v4205_v39 }
 0x28e   :  { %3333 = vmatpush3.bf16.msra.mxu0 %v4161_v48  ;;  %v1574_v1 = vand.u32 4294901760, %v4186_v55  ;;  %v3353_v49 = vpack.c.bf16 %v1562_v8, %v1555_v36  ;;  %v1568_v60 = vsub.f32 %v4184_v17, %v1567_v10  ;;  %v4423_v36 = vand.u32 4294901760, %v4205_v39 }
 0x28f   :  { %3334 = vmatprep.subr.bf16.mxu0 %v3569_v2  ;;  %v4169_v31 = vpack.c.bf16 %v1465_v20, %v1462_v59  ;;  %v4193_v56 = vsub.f32 %v1421_v5, %v1462_v59  ;;  %v4428_v59 = vand.u32 4294901760, %v4190_v50  ;;  %v4422_v8 = vand.u32 4294901760, %v4207_v61 }
 0x290   :  { %v1575_v0 = vsub.f32 %v4186_v55, %v1574_v1  ;;  %v1569_v43 = vand.u32 4294901760, %v1568_v60  ;;  %v3365_v60 = vpack.c.bf16 %v1618_v16, %v1611_v28  ;;  %v3380_v62 = vpack.c.bf16 %v4186_v55, %v4184_v17  ;;  %v2095_v28 = vld [vmem:[#allocation2 + $0x3] ss:$0 sm:$0xff] }
 0x291   :  { %v1589_v41 = vsub.f32 %v4190_v50, %v4428_v59  ;;  %v4427_v32 = vand.u32 4294901760, %v4193_v56  ;;  %v4444_v17 = vand.u32 4294901760, %v4197_v4  ;;  %v4445_v55 = vand.u32 4294901760, %v4199_v25 }
 0x292   :  { %3336 = vmatpush3.bf16.msra.mxu0 %v4165_v3  ;;  %v1576_v5 = vand.u32 4294901760, %v1575_v0  ;;  %v1624_v0 = vsub.f32 %v4205_v39, %v4423_v36 }
 0x293   :  { %3337 = vmatprep.subr.bf16.mxu0 %v3569_v2  ;;  %v1590_v13 = vand.u32 4294901760, %v1589_v41  ;;  %v1596_v40 = vsub.f32 %v4193_v56, %v4427_v32 }
 0x294   :  { %v3356_v20 = vpack.c.bf16 %v1576_v5, %v1569_v43  ;;  %v1631_v43 = vsub.f32 %v4207_v61, %v4422_v8  ;;  %v1625_v5 = vand.u32 4294901760, %v1624_v0 }
 0x295   :  { %v3359_v30 = vpack.c.bf16 %v1590_v13, %v1583_v38  ;;  %v1597_v7 = vand.u32 4294901760, %v1596_v40  ;;  %v3371_v38 = vpack.c.bf16 %v4060_v22, %v4058_v37  ;;  %v3374_v13 = vpack.c.bf16 %v4177_v51, %v4175_v21 }
 0x296   :  { %3339 = vmatpush3.bf16.msra.mxu0 %v4169_v31  ;;  %v1632_v34 = vand.u32 4294901760, %v1631_v43  ;;  %v3377_v40 = vpack.c.bf16 %v4181_v54, %v4179_v53  ;;  %v3425_v37 = vpack.c.bf16 %v1560_v52, %v1553_v35  ;;  %v3428_v22 = vpack.c.bf16 %v1574_v1, %v1567_v10 }
 0x297   :  { %3340 = vmatprep.subr.bf16.mxu0 %v3569_v2  ;;  %v3362_v18 = vpack.c.bf16 %v1604_v15, %v1597_v7  ;;  %v3383_v7 = vpack.c.bf16 %v4190_v50, %v4188_v26  ;;  %v3386_v15 = vpack.c.bf16 %v4195_v11, %v4193_v56  ;;  %v4441_v21 = vand.u32 4294901760, %v4190_v50 }
 0x298   :  { %v3368_v41 = vpack.c.bf16 %v1632_v34, %v1625_v5  ;;  %v4442_v53 = vand.u32 4294901760, %v4193_v56  ;;  %v4443_v54 = vand.u32 4294901760, %v4195_v11  ;;  %v4446_v26 = vand.u32 4294901760, %v4205_v39 }
 0x299   :  { %v3431_v51 = vpack.c.bf16 %v4441_v21, %v1581_v58  ;;  %v4447_v50 = vand.u32 4294901760, %v4207_v61 }
 0x29a   :  { %3342 = vmatpush3.bf16.msra.mxu0 %v4173_v14 }
 0x29b   :  { %3343 = vmatprep.subr.bf16.mxu0 %v3569_v2 }
 0x29e   :  { %3345 = vmatpush3.bf16.msra.mxu0 %v4203_v46 }
 0x29f   :  { %3346 = vmatprep.subr.bf16.mxu0 %v3569_v2 }
 0x35f   :  { %v1402_v16 = vpop.f32.mrb[2].mxu1 }
 0x360   :  { %v3468_v0 = vadd.f32 %v2095_v28, %v1402_v16  ;;  %v2823_v43 = vpop.f32.mrb[3].mxu1 }
 0x362   :  { %v1407_v5 = vmul.f32 1.442695, %v3468_v0  ;;  %vm1406_vm3 = vcmp.gt.f32.partialorder %v3468_v0, 0.0 }
 0x364   :  { %3514 = vpow2.f32 %v1407_v5 }
 0x36e   :  { %v3515_v34 = vpop.eup %3514 }
 0x36f   :  { %v2096_v8 = vadd.f32 -1.0, %v3515_v34 }
 0x371   :  { %v1410_v36 = vsel %vm1406_vm3, %v3468_v0, %v2096_v8 }
 0x372   :  { %v4293_v24 = vand.u32 4294901760, %v1410_v36 }
 0x374   :  { %v1513_v23 = vsub.f32 %v1410_v36, %v4293_v24 }
 0x376   :  { %v1514_v42 = vand.u32 4294901760, %v1513_v23 }
 0x378   :  { %v1515_v32 = vsub.f32 %v1513_v23, %v1514_v42 }
 0x37a   :  { %v1516_v59 = vand.u32 4294901760, %v1515_v32 }
 0x37c   :  { %2857 = vmatmul.mubr.f32.vlgmr.msra.gmra.mrb[2].mxu0 %v1516_v59 }
 0x37d   :  { %3348 = vmatpush3.bf16.msra.mxu0 %v4227_v57  ;;  %2891 = vmatprep.mubr.msk.f32.mxu0 %vm3570_vm0, %v3571_v63  ;;  %v3419_v57 = vpack.c.bf16 %v1532_v45, %v1525_v47  ;;  %v3434_v47 = vpack.c.bf16 %v4443_v54, %v4442_v53  ;;  %v3437_v45 = vpack.c.bf16 %v4445_v55, %v4444_v17 }
 0x37e   :  { %3349 = vmatprep.subr.bf16.mxu0 %v3569_v2 }
 0x381   :  { %3351 = vmatpush3.bf16.msra.mxu0 %v4235_v29  ;;  %v3422_v29 = vpack.c.bf16 %v1546_v19, %v1539_v12  ;;  %v3440_v12 = vpack.c.bf16 %v4447_v50, %v4446_v26 }
 0x382   :  { %3352 = vmatprep.subr.bf16.mxu0 %v3569_v2 }
 0x385   :  { %3354 = vmatpush3.bf16.msra.mxu0 %v3353_v49 }
 0x386   :  { %3355 = vmatprep.subr.bf16.mxu0 %v3569_v2 }
 0x389   :  { %3357 = vmatpush3.bf16.msra.mxu0 %v3356_v20 }
 0x38a   :  { %3358 = vmatprep.subr.bf16.mxu0 %v3569_v2 }
 0x38d   :  { %3360 = vmatpush3.bf16.msra.mxu0 %v3359_v30 }
 0x38e   :  { %3361 = vmatprep.subr.bf16.mxu0 %v3569_v2 }
 0x391   :  { %3363 = vmatpush3.bf16.msra.mxu0 %v3362_v18 }
 0x392   :  { %3364 = vmatprep.subr.bf16.mxu0 %v3569_v2 }
 0x395   :  { %3366 = vmatpush3.bf16.msra.mxu0 %v3365_v60 }
 0x396   :  { %3367 = vmatprep.subr.bf16.mxu0 %v3569_v2 }
 0x399   :  { %3369 = vmatpush3.bf16.msra.mxu0 %v3368_v41 }
 0x39a   :  { %3370 = vmatprep.subr.bf16.mxu0 %v3569_v2 }
 0x39c   :  { %2892 = vmatmul.mubr.f32.vlgmr.msra.gmra.mrb[2].mxu0 %v4293_v24 }
 0x39d   :  { %3372 = vmatpush3.bf16.msra.mxu0 %v3371_v38  ;;  %2926 = vmatprep.mubr.msk.f32.mxu0 %vm3570_vm0, %v3571_v63 }
 0x39e   :  { %3373 = vmatprep.subr.bf16.mxu0 %v3569_v2 }
 0x3a1   :  { %3375 = vmatpush3.bf16.msra.mxu0 %v3374_v13 }
 0x3a2   :  { %3376 = vmatprep.subr.bf16.mxu0 %v3569_v2 }
 0x3a5   :  { %3378 = vmatpush3.bf16.msra.mxu0 %v3377_v40 }
 0x3a6   :  { %3379 = vmatprep.subr.bf16.mxu0 %v3569_v2 }
 0x3a9   :  { %3381 = vmatpush3.bf16.msra.mxu0 %v3380_v62 }
 0x3aa   :  { %3382 = vmatprep.subr.bf16.mxu0 %v3569_v2 }
 0x3ad   :  { %3384 = vmatpush3.bf16.msra.mxu0 %v3383_v7 }
 0x3ae   :  { %3385 = vmatprep.subr.bf16.mxu0 %v3569_v2 }
 0x3b1   :  { %3387 = vmatpush3.bf16.msra.mxu0 %v3386_v15 }
 0x3b2   :  { %3388 = vmatprep.subr.bf16.mxu0 %v3569_v2 }
 0x3b5   :  { %3390 = vmatpush3.bf16.msra.mxu0 %v3389_v9 }
 0x3b6   :  { %3391 = vmatprep.subr.bf16.mxu0 %v3569_v2 }
 0x3b9   :  { %3393 = vmatpush3.bf16.msra.mxu0 %v3392_v33 }
 0x3ba   :  { %3394 = vmatprep.subr.bf16.mxu0 %v3569_v2 }
 0x3bc   :  { %2927 = vmatmul.mubr.f32.vlgmr.msra.gmra.mrb[2].mxu0 %v1513_v23 }
 0x3bd   :  { %3396 = vmatpush3.bf16.msra.mxu0 %v4056_v6  ;;  %2961 = vmatprep.mubr.msk.f32.mxu0 %vm3570_vm0, %v3571_v63 }
 0x3be   :  { %3397 = vmatprep.subr.bf16.mxu0 %v3569_v2 }
 0x3c1   :  { %3399 = vmatpush3.bf16.msra.mxu0 %v4153_v27 }
 0x3c2   :  { %3400 = vmatprep.subr.bf16.mxu0 %v3569_v2 }
 0x3c5   :  { %3402 = vmatpush3.bf16.msra.mxu0 %v4157_v44 }
 0x3c6   :  { %3403 = vmatprep.subr.bf16.mxu0 %v3569_v2 }
 0x3c9   :  { %3405 = vmatpush3.bf16.msra.mxu0 %v4161_v48 }
 0x3ca   :  { %3406 = vmatprep.subr.bf16.mxu0 %v3569_v2 }
 0x3cd   :  { %3408 = vmatpush3.bf16.msra.mxu0 %v4165_v3 }
 0x3ce   :  { %3409 = vmatprep.subr.bf16.mxu0 %v3569_v2 }
 0x3d1   :  { %3411 = vmatpush3.bf16.msra.mxu0 %v4169_v31 }
 0x3d2   :  { %3412 = vmatprep.subr.bf16.mxu0 %v3569_v2 }
 0x3d5   :  { %3414 = vmatpush3.bf16.msra.mxu0 %v4173_v14 }
 0x3d6   :  { %3415 = vmatprep.subr.bf16.mxu0 %v3569_v2 }
 0x3d9   :  { %3417 = vmatpush3.bf16.msra.mxu0 %v4203_v46 }
 0x3da   :  { %3418 = vmatprep.subr.bf16.mxu0 %v3569_v2 }
 0x3dc   :  { %2962 = vmatmul.mubr.f32.vlgmr.msra.gmra.mrb[2].mxu0 %v1514_v42 }
 0x3dd   :  { %3420 = vmatpush3.bf16.msra.mxu0 %v3419_v57  ;;  %2996 = vmatprep.mubr.msk.f32.mxu0 %vm3570_vm0, %v3571_v63 }
 0x3de   :  { %3421 = vmatprep.subr.bf16.mxu0 %v3569_v2 }
 0x3e1   :  { %3423 = vmatpush3.bf16.msra.mxu0 %v3422_v29 }
 0x3e2   :  { %3424 = vmatprep.subr.bf16.mxu0 %v3569_v2 }
 0x3e5   :  { %3426 = vmatpush3.bf16.msra.mxu0 %v3425_v37 }
 0x3e6   :  { %3427 = vmatprep.subr.bf16.mxu0 %v3569_v2 }
 0x3e9   :  { %3429 = vmatpush3.bf16.msra.mxu0 %v3428_v22 }
 0x3ea   :  { %3430 = vmatprep.subr.bf16.mxu0 %v3569_v2 }
 0x3ed   :  { %3432 = vmatpush3.bf16.msra.mxu0 %v3431_v51 }
 0x3ee   :  { %3433 = vmatprep.subr.bf16.mxu0 %v3569_v2 }
 0x3f1   :  { %3435 = vmatpush3.bf16.msra.mxu0 %v3434_v47 }
 0x3f2   :  { %3436 = vmatprep.subr.bf16.mxu0 %v3569_v2 }
 0x3f5   :  { %3438 = vmatpush3.bf16.msra.mxu0 %v3437_v45 }
 0x3f6   :  { %3439 = vmatprep.subr.bf16.mxu0 %v3569_v2 }
 0x3f9   :  { %3441 = vmatpush3.bf16.msra.mxu0 %v3440_v12 }
 0x3fa   :  { %3442 = vmatprep.subr.bf16.mxu0 %v3569_v2 }
 0x3fc   :  { %2997 = vmatmul.mubr.f32.vlgmr.msra.gmra.mrb[2].mxu0 %v4293_v24 }
 0x3fd   :  { %3444 = vmatpush3.bf16.msra.mxu0 %v4056_v6  ;;  %3031 = vmatprep.mubr.msk.f32.mxu0 %vm3570_vm0, %v3571_v63  ;;  %v2097_v63 = vld [vmem:[#allocation2 + $0x4] ss:$0 sm:$0xff] }
 0x3fe   :  { %3445 = vmatprep.subr.bf16.mxu0 %v3569_v2 }
 0x401   :  { %3447 = vmatpush3.bf16.msra.mxu0 %v4153_v27 }
 0x402   :  { %3448 = vmatprep.subr.bf16.mxu0 %v3569_v2 }
 0x405   :  { %3450 = vmatpush3.bf16.msra.mxu0 %v4157_v44 }
 0x406   :  { %3451 = vmatprep.subr.bf16.mxu0 %v3569_v2 }
 0x409   :  { %3453 = vmatpush3.bf16.msra.mxu0 %v4161_v48 }
 0x40a   :  { %3454 = vmatprep.subr.bf16.mxu0 %v3569_v2 }
 0x40d   :  { %3456 = vmatpush3.bf16.msra.mxu0 %v4165_v3 }
 0x40e   :  { %3457 = vmatprep.subr.bf16.mxu0 %v3569_v2 }
 0x411   :  { %3459 = vmatpush3.bf16.msra.mxu0 %v4169_v31 }
 0x412   :  { %3460 = vmatprep.subr.bf16.mxu0 %v3569_v2 }
 0x415   :  { %3462 = vmatpush3.bf16.msra.mxu0 %v4173_v14 }
 0x416   :  { %3463 = vmatprep.subr.bf16.mxu0 %v3569_v2 }
 0x419   :  { %3465 = vmatpush3.bf16.msra.mxu0 %v4203_v46 }
 0x41c   :  { %3032 = vmatmul.mubr.f32.vlgmr.msra.gmra.mrb[2].mxu0 %v4293_v24 }
 0x4ef   :  { %v2068_v6 = vpop.f32.mrb[2].mxu0 }
 0x4f0   :  { %v3469_v27 = vadd.f32 %v2097_v63, %v2068_v6  ;;  %v3033_v44 = vpop.f32.mrb[3].mxu0 }
 0x4f2   :  { %2072 = vst [vmem:[#allocation5] sm:$0xff] %v3469_v27 }
 0x4f3   :  { %3549 = shalt.err (!%p3546_p12)
}
 0x4f4   :  { %s3550_s5 = scalar_lea.hbm %s4413_s3, 128 }
 0x4f5   :  { %p3551_p13 = scmp.ne.s32.totalorder %s4413_s3, %s3550_s5  ;;  %p3554_p0 = scmp.lt.u32.totalorder %s3550_s5, %s4413_s3 }
 0x4f7   :  { %p3556_p1 = pnand %p3554_p0, %p3551_p13 }
 0x4f9   :  { %3559 = shalt.err (!%p3556_p1)
}
 0x4fa   :  { %2082 = dma.vmem_to_hbm [thread:$0]  %s2080_s1, 128, %s4413_s3, [#allocation4]  }
 0x4fb   :  { %3562 = dma.done.wait [#allocation4], 128  }
 0x4fc   :  { %3563 = vsyncadd [#allocation4], 4294967168 }
 0x4fd   :  { %2086 = vsyncpa [#allocation3], 1 }
 0x4fe   :  { %2087 = vsyncpa [#allocation4], 1 }

</bundles_post_ra>
